<compile_context>
chip_gen: v7x
topology: tpu7x:2x2x1
jax: 0.10.0
libtpu: 0.0.40
codegen_flags: <defaults>
</compile_context>

<pallas_src>
import jax
import jax.numpy as jnp
from jax.experimental import pallas as pl
from jax.experimental.pallas import tpu as pltpu

D_MODEL = 128
EPS = 1e-5


def _additive_atn_kernel(src_ref, v_ref, g_ref, b_ref, o_ref):
    # src_ref: (Bt, TS, D), v_ref: (Bt, 1, D), g_ref/b_ref: (1, D), o_ref: (Bt, TS, D)
    x = src_ref[...].astype(jnp.float32) + v_ref[...].astype(jnp.float32)
    inv_d = 1.0 / x.shape[-1]
    mean = jnp.sum(x, axis=-1, keepdims=True) * inv_d
    centered = x - mean
    # Two-pass biased variance (matches torch LayerNorm, robust to large means).
    var = jnp.sum(centered * centered, axis=-1, keepdims=True) * inv_d
    inv = jax.lax.rsqrt(var + EPS)
    g = g_ref[...].astype(jnp.float32)   # (1, D) broadcasts against (Bt, TS, D)
    b = b_ref[...].astype(jnp.float32)
    o_ref[...] = (centered * inv * g + b).astype(o_ref.dtype)


def _choose_tiles(B, S, max_rows=2048):
    """Pick (Bt, TS).

    - Long sequences: TS = max_rows (multiple of 8), Bt = 1; seq tail is a partial
      (padded) block handled by pl.cdiv.
    - Short sequences: TS = S (full second-to-last extent is always legal) and fold
      several batch rows per step (Bt) so each grid step moves a ~1 MiB slab; the
      batch axis uses pl.cdiv so no divisibility constraint on B (partial leading-dim
      tail blocks are legal).
    """
    max_rows = max(8, max_rows)
    if S >= max_rows:
        TS = max_rows                          # multiple of 8 by construction
        Bt = 1
    else:
        TS = S                                 # full-extent 2nd-to-last dim is legal
        Bt = max(1, min(B, max_rows // max(TS, 1)))
    return Bt, TS


def additive_atn(src, k, v, gamma, beta, *, max_rows=2048):
    """Pallas implementation of Additive_atn.forward(src, k, v)."""
    del k  # unused in the reference forward
    B, S, D = src.shape
    assert v.shape == (B, 1, D)
    gamma2d = gamma.reshape(1, D)
    beta2d = beta.reshape(1, D)

    Bt, TS = _choose_tiles(B, S, max_rows)
    grid = (pl.cdiv(B, Bt), pl.cdiv(S, TS))

    return pl.pallas_call(
        _additive_atn_kernel,
        out_shape=jax.ShapeDtypeStruct((B, S, D), src.dtype),
        grid_spec=pltpu.PrefetchScalarGridSpec(
            num_scalar_prefetch=0,
            grid=grid,
            in_specs=[
                pl.BlockSpec((Bt, TS, D), lambda b, s: (b, s, 0)),  # src tile
                pl.BlockSpec((Bt, 1, D), lambda b, s: (b, 0, 0)),   # v tile (seq-broadcast)
                pl.BlockSpec((1, D), lambda b, s: (0, 0)),          # layernorm weight
                pl.BlockSpec((1, D), lambda b, s: (0, 0)),          # layernorm bias
            ],
            out_specs=pl.BlockSpec((Bt, TS, D), lambda b, s: (b, s, 0)),
        ),
        compiler_params=pltpu.CompilerParams(
            dimension_semantics=("parallel", "parallel")),
    )(src, v, gamma2d, beta2d)


def additive_atn_ref(src, k, v, gamma, beta):
    del k
    x = src + v  # broadcast over seq == v.repeat([1, S, 1])
    mean = jnp.mean(x, axis=-1, keepdims=True)
    var = jnp.mean((x - mean) ** 2, axis=-1, keepdims=True)
    return (x - mean) * jax.lax.rsqrt(var + EPS) * gamma + beta


def _run_case(key, B, S, D, max_rows=2048):
    k1, k2, k3 = jax.random.split(key, 3)
    src = jax.random.normal(k1, (B, S, D), dtype=jnp.float32)
    k_in = jax.random.normal(k2, (B, S, D), dtype=jnp.float32)  # unused by forward
    v = jax.random.normal(k3, (B, 1, D), dtype=jnp.float32)
    # nn.LayerNorm(d_model) default init: weight=ones, bias=zeros (deterministic)
    gamma = jnp.ones((D,), dtype=jnp.float32)
    beta = jnp.zeros((D,), dtype=jnp.float32)

    out = additive_atn(src, k_in, v, gamma, beta, max_rows=max_rows)
    jax.block_until_ready(out)
    ref = additive_atn_ref(src, k_in, v, gamma, beta)
    assert out.shape == (B, S, D)
    assert jnp.allclose(out, ref, atol=1e-5, rtol=1e-5)


if __name__ == "__main__":
    key = jax.random.PRNGKey(0)
    k0, k1, k2, k3 = jax.random.split(key, 4)

    # Module-sized small case (batch folding path: Bt=2, TS=8, single grid step).
    _run_case(k0, B=2, S=8, D=D_MODEL)
    # Non-divisible batch with small seq (cdiv batch axis, no divisibility loop).
    _run_case(k1, B=3, S=40, D=D_MODEL)
    # Exercise partial seq-tail blocks (S tiled into 16-row blocks, tail = 8 rows).
    _run_case(k2, B=3, S=40, D=D_MODEL, max_rows=16)
    # Exercise partial batch-tail block (Bt=4 folds over B=5 -> padded tail block).
    _run_case(k3, B=5, S=4, D=D_MODEL, max_rows=16)

    print("KERNEL_OK")
</pallas_src>

<mosaic_0001>
module attributes {stable_mosaic.version = 11 : i64} {
  func.func @_additive_atn_kernel(%arg0: i32, %arg1: i32, %arg2: memref<2x8x128xf32, #tpu.memory_space<vmem>>, %arg3: memref<2x1x128xf32, #tpu.memory_space<vmem>>, %arg4: memref<1x128xf32, #tpu.memory_space<vmem>>, %arg5: memref<1x128xf32, #tpu.memory_space<vmem>>, %arg6: memref<2x8x128xf32, #tpu.memory_space<vmem>>) attributes {dimension_semantics = [#tpu.dimension_semantics<parallel>, #tpu.dimension_semantics<parallel>], iteration_bounds = array<i64: 1, 1>, scalar_prefetch = 0 : i64, scratch_operands = 0 : i64, tpu.core_type = #tpu.core_type<tc>, window_params = [{transform_indices = @transform_0, window_bounds = array<i64: 2, 8, 128>}, {transform_indices = @transform_1, window_bounds = array<i64: 2, 1, 128>}, {pipeline_mode = #tpu.pipeline_mode<synchronous>, transform_indices = @transform_2, window_bounds = array<i64: 1, 128>}, {pipeline_mode = #tpu.pipeline_mode<synchronous>, transform_indices = @transform_3, window_bounds = array<i64: 1, 128>}, {transform_indices = @transform_4, window_bounds = array<i64: 2, 8, 128>}]} {
    %c0 = arith.constant 0 : index
    %c0_0 = arith.constant 0 : index
    %c0_1 = arith.constant 0 : index
    %0 = vector.load %arg2[%c0, %c0_0, %c0_1] : memref<2x8x128xf32, #tpu.memory_space<vmem>>, vector<2x8x128xf32>
    %c0_2 = arith.constant 0 : index
    %c0_3 = arith.constant 0 : index
    %c0_4 = arith.constant 0 : index
    %1 = vector.load %arg3[%c0_2, %c0_3, %c0_4] : memref<2x1x128xf32, #tpu.memory_space<vmem>>, vector<2x1x128xf32>
    %2 = vector.broadcast %1 : vector<2x1x128xf32> to vector<2x8x128xf32>
    %3 = arith.addf %0, %2 : vector<2x8x128xf32>
    %cst = arith.constant dense<0.000000e+00> : vector<2x8xf32>
    %4 = vector.multi_reduction <add>, %3, %cst [2] : vector<2x8x128xf32> to vector<2x8xf32>
    %5 = vector.shape_cast %4 : vector<2x8xf32> to vector<2x8x1xf32>
    %cst_5 = arith.constant 7.812500e-03 : f32
    %6 = vector.broadcast %cst_5 : f32 to vector<2x8x1xf32>
    %7 = arith.mulf %5, %6 : vector<2x8x1xf32>
    %8 = vector.broadcast %7 : vector<2x8x1xf32> to vector<2x8x128xf32>
    %9 = arith.subf %3, %8 : vector<2x8x128xf32>
    %10 = arith.mulf %9, %9 : vector<2x8x128xf32>
    %cst_6 = arith.constant dense<0.000000e+00> : vector<2x8xf32>
    %11 = vector.multi_reduction <add>, %10, %cst_6 [2] : vector<2x8x128xf32> to vector<2x8xf32>
    %12 = vector.shape_cast %11 : vector<2x8xf32> to vector<2x8x1xf32>
    %cst_7 = arith.constant 7.812500e-03 : f32
    %13 = vector.broadcast %cst_7 : f32 to vector<2x8x1xf32>
    %14 = arith.mulf %12, %13 : vector<2x8x1xf32>
    %cst_8 = arith.constant 9.99999974E-6 : f32
    %15 = vector.broadcast %cst_8 : f32 to vector<2x8x1xf32>
    %16 = arith.addf %14, %15 : vector<2x8x1xf32>
    %17 = math.rsqrt %16 : vector<2x8x1xf32>
    %c0_9 = arith.constant 0 : index
    %c0_10 = arith.constant 0 : index
    %18 = vector.load %arg4[%c0_9, %c0_10] : memref<1x128xf32, #tpu.memory_space<vmem>>, vector<1x128xf32>
    %c0_11 = arith.constant 0 : index
    %c0_12 = arith.constant 0 : index
    %19 = vector.load %arg5[%c0_11, %c0_12] : memref<1x128xf32, #tpu.memory_space<vmem>>, vector<1x128xf32>
    %20 = vector.broadcast %17 : vector<2x8x1xf32> to vector<2x8x128xf32>
    %21 = arith.mulf %9, %20 : vector<2x8x128xf32>
    %22 = vector.shape_cast %18 : vector<1x128xf32> to vector<1x1x128xf32>
    %23 = vector.broadcast %22 : vector<1x1x128xf32> to vector<2x8x128xf32>
    %24 = arith.mulf %21, %23 : vector<2x8x128xf32>
    %25 = vector.shape_cast %19 : vector<1x128xf32> to vector<1x1x128xf32>
    %26 = vector.broadcast %25 : vector<1x1x128xf32> to vector<2x8x128xf32>
    %27 = arith.addf %24, %26 : vector<2x8x128xf32>
    %c0_13 = arith.constant 0 : index
    %c0_14 = arith.constant 0 : index
    %c0_15 = arith.constant 0 : index
    %28 = vector.load %arg6[%c0_13, %c0_14, %c0_15] : memref<2x8x128xf32, #tpu.memory_space<vmem>>, vector<2x8x128xf32>
    tpu.vector_store %arg6[%c0_13, %c0_14, %c0_15], %27 {strides = array<i32>} : memref<2x8x128xf32, #tpu.memory_space<vmem>>, vector<2x8x128xf32>,
    return
  }
  func.func @transform_0(%arg0: i32, %arg1: i32) -> (i32, i32, i32) {
    %c0_i32 = arith.constant 0 : i32
    %c0_i32_0 = arith.constant 0 : i32
    return %arg0, %arg1, %c0_i32 : i32, i32, i32
  }
  func.func @transform_1(%arg0: i32, %arg1: i32) -> (i32, i32, i32) {
    %c0_i32 = arith.constant 0 : i32
    %c0_i32_0 = arith.constant 0 : i32
    %c0_i32_1 = arith.constant 0 : i32
    return %arg0, %c0_i32, %c0_i32_0 : i32, i32, i32
  }
  func.func @transform_2(%arg0: i32, %arg1: i32) -> (i32, i32) {
    %c0_i32 = arith.constant 0 : i32
    %c0_i32_0 = arith.constant 0 : i32
    %c0_i32_1 = arith.constant 0 : i32
    return %c0_i32, %c0_i32_0 : i32, i32
  }
  func.func @transform_3(%arg0: i32, %arg1: i32) -> (i32, i32) {
    %c0_i32 = arith.constant 0 : i32
    %c0_i32_0 = arith.constant 0 : i32
    %c0_i32_1 = arith.constant 0 : i32
    return %c0_i32, %c0_i32_0 : i32, i32
  }
  func.func @transform_4(%arg0: i32, %arg1: i32) -> (i32, i32, i32) {
    %c0_i32 = arith.constant 0 : i32
    %c0_i32_0 = arith.constant 0 : i32
    return %arg0, %arg1, %c0_i32 : i32, i32, i32
  }
}

</mosaic_0001>

<bundles_post_ra>
// kernel: tpu_custom_call.1
= control target key start
LH: loop header
LB: loop body
LE: loop exit
PB: predicated region body
PF: predicated region fallthrough
CT: control target
= control target key end

     0   :  { %9 = vsyncpa [#allocation3], 0  ;;  %s240_s0 = inlined_call_operand.hbm [shape: f32[2,8,128], index: 0, kind: input, shape index: {}]   ;;  %s241_s1 = inlined_call_operand.vmem [shape: f32[2,1,128], index: 1, kind: input, shape index: {}]   ;;  %s242_s2 = inlined_call_operand.vmem [shape: f32[1,128], index: 2, kind: input, shape index: {}]   ;;  %s243_s3 = inlined_call_operand.vmem [shape: f32[1,128], index: 3, kind: input, shape index: {}]   ;;  %s244_s4 = inlined_call_operand.hbm [shape: f32[2,8,128], index: 4, kind: output, shape index: {}]  }
   0x1   :  { %10 = vsyncpa [#allocation4], 0  ;;  %s169_s15 = smov [#allocation2]   ;;  %s121_s19 = scalar_lea.hbm %s240_s0, 256 }
   0x2   :  { %s16_s16 = sshll.u32 %s169_s15, 4  ;;  %p122_p0 = scmp.ne.s32.totalorder %s240_s0, %s121_s19  ;;  %s17_s16 = int_to_ptr.vmem [resolvable:$true] %s16_s16 }
   0x3   :  { %p125_p1 = scmp.lt.u32.totalorder %s121_s19, %s240_s0 }
   0x5   :  { %p127_p2 = pnand %p125_p1, %p122_p0 }
   0x7   :  { %130 = shalt.err (!%p127_p2)
}
   0x8   :  { %s131_s24 = scalar_lea.vmem %s17_s16, 256  ;;  %p136_p4 = scmp.lt.s32.totalorder %s17_s16, %s17_s16 }
   0x9   :  { %p132_p3 = scmp.ne.s32.totalorder %s17_s16, %s131_s24  ;;  %p137_p5 = scmp.lt.s32.totalorder %s131_s24, %s131_s24 }
   0xb   :  { %p138_p6 = por %p137_p5, %p136_p4 }
   0xd   :  { %p139_p7 = pnand %p138_p6, %p132_p3 }
   0xf   :  { %142 = shalt.err (!%p139_p7)
}
  0x10   :  { %s170_s25 = smov 128   ;;  %s171_s26 = smov 8  }
  0x11   :  { %22 = dma.hbm_to_vmem [thread:$0]  %s240_s0, 256, %s17_s16, [#allocation3], %s170_s25, %s170_s25, %s171_s26  }
  0x12   :  { %165 = dma.done.wait [#allocation3], 256  }
  0x13   :  { %166 = vsyncadd [#allocation3], 4294967040  ;;  %v32_v0 = vld [vmem:[#allocation2] sm:$0xff]  ;;  %v33_v2 = vld [vmem:[#allocation2 + $0x8] sm:$0xff]  ;;  %s172_s9 = smov [#allocation5]  }
  0x14   :  { %v109_v1 = vld [vmem:[%s241_s1] ss:$0 sm:$0xff]  ;;  %v110_v4 = vld [vmem:[%s241_s1 + $0x1] ss:$0 sm:$0xff]  ;;  %s97_s10 = sshll.u32 %s172_s9, 4  ;;  %s98_s10 = int_to_ptr.vmem [resolvable:$true] %s97_s10 }
  0x15   :  { %v48_v3 = vadd.f32 %v109_v1, %v32_v0  ;;  %v49_v5 = vadd.f32 %v110_v4, %v33_v2  ;;  %v111_v21 = vld [vmem:[%s242_s2] ss:$0 sm:$0xff]  ;;  %s143_s11 = scalar_lea.vmem %s98_s10, 256  ;;  %p148_p9 = scmp.lt.s32.totalorder %s98_s10, %s98_s10 }
  0x16   :  { %v112_v23 = vld [vmem:[%s243_s3] ss:$0 sm:$0xff]  ;;  %p144_p8 = scmp.ne.s32.totalorder %s98_s10, %s143_s11  ;;  %p149_p10 = scmp.lt.s32.totalorder %s143_s11, %s143_s11 }
  0x17   :  { %50 = vadd.xlane.f32.xlu0 %v48_v3 }
  0x18   :  { %p150_p11 = por %p149_p10, %p148_p9 }
  0x1a   :  { %p151_p12 = pnand %p150_p11, %p144_p8 }
  0x1b   :  { %52 = vadd.xlane.f32.xlu0 %v49_v5 }
  0xa4   :  { %v51_v6 = vpop.xlane.xlu0 %50 }
  0xa5   :  { %v54_v7 = vmul.f32 0.0078125, %v51_v6 }
  0xa7   :  { %v56_v8 = vsub.f32 %v48_v3, %v54_v7 }
  0xa8   :  { %v53_v9 = vpop.xlane.xlu0 %52 }
  0xa9   :  { %v55_v10 = vmul.f32 0.0078125, %v53_v9  ;;  %v58_v11 = vmul.f32 %v56_v8, %v56_v8 }
  0xab   :  { %v57_v12 = vsub.f32 %v49_v5, %v55_v10  ;;  %60 = vadd.xlane.f32.xlu1 %v58_v11 }
  0xad   :  { %v59_v13 = vmul.f32 %v57_v12, %v57_v12 }
  0xaf   :  { %62 = vadd.xlane.f32.xlu1 %v59_v13 }
 0x138   :  { %v61_v14 = vpop.xlane.xlu1 %60 }
 0x139   :  { %v64_v15 = vmul.f32 0.0078125, %v61_v14 }
 0x13b   :  { %v66_v16 = vadd.f32 1e-05, %v64_v15 }
 0x13c   :  { %v63_v17 = vpop.xlane.xlu1 %62 }
 0x13d   :  { %117 = vrsqrt.f32 %v66_v16  ;;  %v65_v18 = vmul.f32 0.0078125, %v63_v17 }
 0x13f   :  { %v67_v19 = vadd.f32 1e-05, %v65_v18 }
 0x141   :  { %119 = vrsqrt.f32 %v67_v19 }
 0x147   :  { %v118_v20 = vpop.eup %117 }
 0x148   :  { %v72_v22 = vmul.f32 %v118_v20, %v56_v8 }
 0x14a   :  { %v80_v24 = vmul.f32 %v111_v21, %v72_v22 }
 0x14b   :  { %v120_v25 = vpop.eup %119 }
 0x14c   :  { %v73_v26 = vmul.f32 %v120_v25, %v57_v12  ;;  %v88_v27 = vadd.f32 %v112_v23, %v80_v24 }
 0x14e   :  { %v81_v28 = vmul.f32 %v111_v21, %v73_v26  ;;  %90 = vst [vmem:[#allocation5] sm:$0xff] %v88_v27 }
 0x150   :  { %v89_v29 = vadd.f32 %v112_v23, %v81_v28 }
 0x152   :  { %91 = vst [vmem:[#allocation5 + $0x8] sm:$0xff] %v89_v29 }
 0x153   :  { %154 = shalt.err (!%p151_p12)
}
 0x154   :  { %s155_s12 = scalar_lea.hbm %s244_s4, 256 }
 0x155   :  { %p156_p13 = scmp.ne.s32.totalorder %s244_s4, %s155_s12  ;;  %p159_p0 = scmp.lt.u32.totalorder %s155_s12, %s244_s4 }
 0x157   :  { %p161_p1 = pnand %p159_p0, %p156_p13 }
 0x159   :  { %164 = shalt.err (!%p161_p1)
}
 0x15a   :  { %103 = dma.vmem_to_hbm [thread:$0]  %s98_s10, 256, %s244_s4, [#allocation4], %s170_s25, %s170_s25, %s171_s26  }
 0x15b   :  { %167 = dma.done.wait [#allocation4], 256  }
 0x15c   :  { %168 = vsyncadd [#allocation4], 4294967040 }
 0x15d   :  { %107 = vsyncpa [#allocation3], 1 }
 0x15e   :  { %108 = vsyncpa [#allocation4], 1 }

</bundles_post_ra>
